<compile_context>
chip_gen: v5e
topology: v5e:2x2
jax: 0.10.0
libtpu: 0.0.40
codegen_flags: <defaults>
</compile_context>

<pallas_src>
import functools

import jax
import jax.numpy as jnp
from jax import lax
from jax.experimental import pallas as pl
from jax.experimental.pallas import tpu as pltpu


# PyTorch LSTM gate order is (i, f, g, o); the kernel uses (i, f, o, g) so the
# sigmoid gates are lane-contiguous.
_GATE_ORDER = (0, 1, 3, 2)   # -> i, f, o, g


# ----------------------------------------------------------------------------
# Fused encoder+decoder kernel
# ----------------------------------------------------------------------------
def _eda_kernel(x_ref, ewih_ref, ebias_ref, ewhh_ref, dwhh_ref, dbias_ref,
                att_ref, *, seq_len, n_dec, batch_padded, hidden):
    """Fused EDA forward.

    x_ref:     (T*BP, D)  time-major, batch-padded encoder input (row=t*BP+b), bf16
    ewih_ref:  (D, 4D)    encoder input->gate weights, fused+transposed, (i,f,o,g), bf16
    ebias_ref: (1, 4D)    encoder fused gate bias (b_ih + b_hh), f32
    ewhh_ref:  (D, 4D)    encoder hidden->gate weights, fused+transposed, bf16
    dwhh_ref:  (D, 4D)    decoder hidden->gate weights, fused+transposed, bf16
    dbias_ref: (1, 4D)    decoder fused gate bias (b_ih + b_hh), f32
    att_ref:   (S, BP, D) output: decoder hidden state at every step, f32
    """
    T, S, BP, D = seq_len, n_dec, batch_padded, hidden

    ewhh = ewhh_ref[...]
    dwhh = dwhh_ref[...]

    # Hoisted + fused encoder input projection: ONE (T*BP, D) @ (D, 4D) bf16
    # matmul covering all gates and all timesteps, bias folded in.  Off the
    # recurrent critical path.
    gx = (jnp.dot(x_ref[...], ewih_ref[...],
                  preferred_element_type=jnp.float32) + ebias_ref[...])

    # Pre-split into per-step slabs before the recurrence; BP is a multiple of
    # 8 so every slice start is sublane-tile aligned (no sublane shuffles on
    # the recurrent chain).
    gx_t = [gx[t * BP:(t + 1) * BP, :] for t in range(T)]

    def lstm_step(z, c):
        # z: (BP, 4D) gate pre-activations in (i, f, o, g) lane order.
        sig = jax.nn.sigmoid(z[:, :3 * D])        # i | f | o  -> one EUP pass
        g = jnp.tanh(z[:, 3 * D:])                # g          -> one EUP pass
        i = sig[:, :D]
        f = sig[:, D:2 * D]
        o = sig[:, 2 * D:3 * D]
        c_new = f * c + i * g
        h_new = o * jnp.tanh(c_new)
        return h_new, c_new

    h = jnp.zeros((BP, D), jnp.float32)
    c = jnp.zeros((BP, D), jnp.float32)

    # ---- encoder recurrence (fully unrolled; only the final (h, c) is kept).
    # Per step: ONE (BP,D)@(D,4D) bf16 MXU dot + elementwise/EUP.
    for t in range(T):
        z = gx_t[t] + jnp.dot(h.astype(jnp.bfloat16), ewhh,
                              preferred_element_type=jnp.float32)
        h, c = lstm_step(z, c)

    # ---- decoder recurrence: decoder input is all zeros (call-site contract)
    # so x @ W_ih vanishes; the step is bias + h @ W_hh.
    dbias = dbias_ref[...]
    for s in range(S):
        z = dbias + jnp.dot(h.astype(jnp.bfloat16), dwhh,
                            preferred_element_type=jnp.float32)
        h, c = lstm_step(z, c)
        att_ref[s] = h


@functools.partial(jax.jit, static_argnames=("n_dec",))
def eda_forward(xs, enc_wih, enc_bias, enc_whh, dec_whh, dec_bias, *, n_dec):
    """xs: (B, T, D) batch-first embeddings.  Returns attractors (B, n_dec, D)."""
    B, T, D = xs.shape
    BP = max(8, ((B + 7) // 8) * 8)          # pad batch to a sublane multiple

    # time-major, batch-padded, flattened once in the wrapper: row = t*BP + b.
    x_tm = jnp.transpose(xs, (1, 0, 2))                       # (T, B, D)
    x_tm = jnp.pad(x_tm, ((0, 0), (0, BP - B), (0, 0)))       # (T, BP, D)
    x_flat = x_tm.reshape(T * BP, D).astype(jnp.bfloat16)

    kernel = functools.partial(_eda_kernel, seq_len=T, n_dec=n_dec,
                               batch_padded=BP, hidden=D)
    vmem = pl.BlockSpec(memory_space=pltpu.MemorySpace.VMEM)
    att_tm = pl.pallas_call(
        kernel,
        out_shape=jax.ShapeDtypeStruct((n_dec, BP, D), jnp.float32),
        in_specs=[vmem] * 6,
        out_specs=vmem,
    )(x_flat, enc_wih, enc_bias, enc_whh, dec_whh, dec_bias)
    return jnp.transpose(att_tm[:, :B, :], (1, 0, 2))         # (B, S, D)


# ----------------------------------------------------------------------------
# Weight packing (done once at construction time)
# ----------------------------------------------------------------------------
def _pack_fused_weight(w):
    """(4D, D) PyTorch-layout weight -> (D, 4D) fused, transposed, (i,f,o,g), bf16."""
    D = w.shape[1]
    blocks = [w[k * D:(k + 1) * D, :].T for k in _GATE_ORDER]
    return jnp.concatenate(blocks, axis=1).astype(jnp.bfloat16)


def _pack_fused_bias(b_ih, b_hh):
    """(4D,) + (4D,) -> (1, 4D) combined bias in (i,f,o,g) order, f32."""
    D = b_ih.shape[0] // 4
    b = (b_ih + b_hh).astype(jnp.float32)
    return jnp.concatenate([b[k * D:(k + 1) * D] for k in _GATE_ORDER]
                           ).reshape(1, 4 * D)


# ----------------------------------------------------------------------------
# Module wrapper
# ----------------------------------------------------------------------------
class EncoderDecoderAttractorPallas:
    """JAX/Pallas re-implementation of EncoderDecoderAttractor.forward."""

    def __init__(self, n_units: int, key):
        self.n_units = n_units
        D = n_units
        keys = jax.random.split(key, 10)
        bound = 1.0 / jnp.sqrt(D)

        def u(k, shape):
            return jax.random.uniform(k, shape, jnp.float32, -bound, bound)

        # raw PyTorch-layout params (kept for the pure-JAX reference)
        self.enc_w_ih = u(keys[0], (4 * D, D))
        self.enc_w_hh = u(keys[1], (4 * D, D))
        self.enc_b_ih = u(keys[2], (4 * D,))
        self.enc_b_hh = u(keys[3], (4 * D,))
        self.dec_w_ih = u(keys[4], (4 * D, D))
        self.dec_w_hh = u(keys[5], (4 * D, D))
        self.dec_b_ih = u(keys[6], (4 * D,))
        self.dec_b_hh = u(keys[7], (4 * D,))
        # counter Linear(n_units, 1) -- kept for completeness (estimate path)
        self.counter_w = u(keys[8], (1, D))
        self.counter_b = u(keys[9], (1,))

        # one-time kernel-ready packing: fused (D,4D) bf16 weights, f32 biases
        self.enc_wih_f = _pack_fused_weight(self.enc_w_ih)       # (D, 4D)
        self.enc_whh_f = _pack_fused_weight(self.enc_w_hh)       # (D, 4D)
        self.enc_bias_f = _pack_fused_bias(self.enc_b_ih, self.enc_b_hh)
        self.dec_whh_f = _pack_fused_weight(self.dec_w_hh)       # (D, 4D)
        self.dec_bias_f = _pack_fused_bias(self.dec_b_ih, self.dec_b_hh)
        # dec_w_ih never multiplies anything but zeros in forward(), so it is
        # not shipped to the kernel.

    def forward(self, xs, zeros):
        """xs: (B, T, D) batch-first embeddings; zeros: (B, S, D).

        Contract: `zeros` must be an all-zeros tensor (as in every PyTorch
        call site) -- only its S dimension is used; the decoder x@W_ih term is
        algebraically dropped.  Returns attractors (B, S, D)."""
        S = zeros.shape[1]
        return eda_forward(xs, self.enc_wih_f, self.enc_bias_f, self.enc_whh_f,
                           self.dec_whh_f, self.dec_bias_f, n_dec=S)


# ----------------------------------------------------------------------------
# Pure-JAX f32 reference (PyTorch LSTM semantics, lax.scan) for correctness.
# ----------------------------------------------------------------------------
def _lstm_ref(x_tm, w_ih, w_hh, b_ih, b_hh, h0, c0):
    D = h0.shape[-1]
    wih_t, whh_t = w_ih.T, w_hh.T
    bias = (b_ih + b_hh)[None, :]

    def step(carry, x_t):
        h, c = carry
        gates = x_t @ wih_t + h @ whh_t + bias
        i = jax.nn.sigmoid(gates[:, 0 * D:1 * D])
        f = jax.nn.sigmoid(gates[:, 1 * D:2 * D])
        g = jnp.tanh(gates[:, 2 * D:3 * D])
        o = jax.nn.sigmoid(gates[:, 3 * D:4 * D])
        c_new = f * c + i * g
        h_new = o * jnp.tanh(c_new)
        return (h_new, c_new), h_new

    (hT, cT), ys = lax.scan(step, (h0, c0), x_tm)
    return ys, hT, cT


def _forward_ref(model, xs, zeros):
    B, T, D = xs.shape
    h0 = jnp.zeros((B, D), jnp.float32)
    c0 = jnp.zeros((B, D), jnp.float32)
    x_tm = jnp.transpose(xs, (1, 0, 2))
    _, hT, cT = _lstm_ref(x_tm, model.enc_w_ih, model.enc_w_hh,
                          model.enc_b_ih, model.enc_b_hh, h0, c0)
    z_tm = jnp.transpose(zeros, (1, 0, 2))
    ys, _, _ = _lstm_ref(z_tm, model.dec_w_ih, model.dec_w_hh,
                         model.dec_b_ih, model.dec_b_hh, hT, cT)
    return jnp.transpose(ys, (1, 0, 2))


if __name__ == "__main__":
    key = jax.random.PRNGKey(0)
    k_param, k_x = jax.random.split(key)

    B, T, D = 2, 8, 32          # batch, seq len, n_units
    S = 4                       # number of decoded attractors (e.g. n_speakers)

    model = EncoderDecoderAttractorPallas(n_units=D, key=k_param)

    xs = jax.random.normal(k_x, (B, T, D), jnp.float32)
    zeros = jnp.zeros((B, S, D), jnp.float32)

    attractors = model.forward(xs, zeros)
    attractors = jax.block_until_ready(attractors)

    ref = _forward_ref(model, xs, zeros)
    assert attractors.shape == (B, S, D)
    # bf16 matmul operands in the kernel (f32 accumulation/state) vs an f32
    # reference: relaxed tolerance per the performance review.
    assert jnp.allclose(attractors, ref, rtol=5e-2, atol=5e-2), (
        "Pallas EDA output mismatch vs reference")

    print("KERNEL_OK")
</pallas_src>

<mosaic_0001>
module attributes {stable_mosaic.version = 11 : i64} {
  func.func @_eda_kernel(%arg0: memref<64x32xbf16, #tpu.memory_space<vmem>>, %arg1: memref<32x128xbf16, #tpu.memory_space<vmem>>, %arg2: memref<1x128xf32, #tpu.memory_space<vmem>>, %arg3: memref<32x128xbf16, #tpu.memory_space<vmem>>, %arg4: memref<32x128xbf16, #tpu.memory_space<vmem>>, %arg5: memref<1x128xf32, #tpu.memory_space<vmem>>, %arg6: memref<4x8x32xf32, #tpu.memory_space<vmem>>) attributes {dimension_semantics = [], scalar_prefetch = 0 : i64, scratch_operands = 0 : i64, tpu.core_type = #tpu.core_type<tc>} {
    %c0 = arith.constant 0 : index
    %c0_0 = arith.constant 0 : index
    %0 = vector.load %arg3[%c0, %c0_0] : memref<32x128xbf16, #tpu.memory_space<vmem>>, vector<32x128xbf16>
    %c0_1 = arith.constant 0 : index
    %c0_2 = arith.constant 0 : index
    %1 = vector.load %arg4[%c0_1, %c0_2] : memref<32x128xbf16, #tpu.memory_space<vmem>>, vector<32x128xbf16>
    %c0_3 = arith.constant 0 : index
    %c0_4 = arith.constant 0 : index
    %2 = vector.load %arg0[%c0_3, %c0_4] : memref<64x32xbf16, #tpu.memory_space<vmem>>, vector<64x32xbf16>
    %c0_5 = arith.constant 0 : index
    %c0_6 = arith.constant 0 : index
    %3 = vector.load %arg1[%c0_5, %c0_6] : memref<32x128xbf16, #tpu.memory_space<vmem>>, vector<32x128xbf16>
    %cst = arith.constant dense<0.000000e+00> : vector<64x128xf32>
    %4 = tpu.matmul %2, %3, %cst {dimension_numbers = #tpu.dot_dimension_numbers<[1], [0], [0], [1], [0, 0, 1, 1], [], []>} : vector<64x32xbf16>, vector<32x128xbf16>, vector<64x128xf32> -> vector<64x128xf32>
    %c0_7 = arith.constant 0 : index
    %c0_8 = arith.constant 0 : index
    %5 = vector.load %arg2[%c0_7, %c0_8] : memref<1x128xf32, #tpu.memory_space<vmem>>, vector<1x128xf32>
    %6 = vector.broadcast %5 : vector<1x128xf32> to vector<64x128xf32>
    %7 = arith.addf %4, %6 : vector<64x128xf32>
    %8 = vector.extract_strided_slice %7 {offsets = [0, 0], sizes = [8, 128], strides = [1, 1]} : vector<64x128xf32> to vector<8x128xf32>
    %9 = vector.extract_strided_slice %7 {offsets = [8, 0], sizes = [8, 128], strides = [1, 1]} : vector<64x128xf32> to vector<8x128xf32>
    %10 = vector.extract_strided_slice %7 {offsets = [16, 0], sizes = [8, 128], strides = [1, 1]} : vector<64x128xf32> to vector<8x128xf32>
    %11 = vector.extract_strided_slice %7 {offsets = [24, 0], sizes = [8, 128], strides = [1, 1]} : vector<64x128xf32> to vector<8x128xf32>
    %12 = vector.extract_strided_slice %7 {offsets = [32, 0], sizes = [8, 128], strides = [1, 1]} : vector<64x128xf32> to vector<8x128xf32>
    %13 = vector.extract_strided_slice %7 {offsets = [40, 0], sizes = [8, 128], strides = [1, 1]} : vector<64x128xf32> to vector<8x128xf32>
    %14 = vector.extract_strided_slice %7 {offsets = [48, 0], sizes = [8, 128], strides = [1, 1]} : vector<64x128xf32> to vector<8x128xf32>
    %15 = vector.extract_strided_slice %7 {offsets = [56, 0], sizes = [8, 128], strides = [1, 1]} : vector<64x128xf32> to vector<8x128xf32>
    %cst_9 = arith.constant 0.000000e+00 : f32
    %16 = vector.broadcast %cst_9 : f32 to vector<8x32xf32>
    %cst_10 = arith.constant 0.000000e+00 : f32
    %17 = vector.broadcast %cst_10 : f32 to vector<8x32xf32>
    %18 = arith.truncf %16 : vector<8x32xf32> to vector<8x32xbf16>
    %cst_11 = arith.constant dense<0.000000e+00> : vector<8x128xf32>
    %19 = tpu.matmul %18, %0, %cst_11 {dimension_numbers = #tpu.dot_dimension_numbers<[1], [0], [0], [1], [0, 0, 1, 1], [], []>} : vector<8x32xbf16>, vector<32x128xbf16>, vector<8x128xf32> -> vector<8x128xf32>
    %20 = arith.addf %8, %19 : vector<8x128xf32>
    %21 = vector.extract_strided_slice %20 {offsets = [0, 0], sizes = [8, 96], strides = [1, 1]} : vector<8x128xf32> to vector<8x96xf32>
    %22 = arith.negf %21 : vector<8x96xf32>
    %23 = math.exp %22 : vector<8x96xf32>
    %cst_12 = arith.constant 1.000000e+00 : f32
    %24 = vector.broadcast %cst_12 : f32 to vector<8x96xf32>
    %25 = arith.addf %24, %23 : vector<8x96xf32>
    %26 = arith.divf %24, %25 : vector<8x96xf32>
    %27 = vector.extract_strided_slice %20 {offsets = [0, 96], sizes = [8, 32], strides = [1, 1]} : vector<8x128xf32> to vector<8x32xf32>
    %28 = math.tanh %27 : vector<8x32xf32>
    %29 = vector.extract_strided_slice %26 {offsets = [0, 0], sizes = [8, 32], strides = [1, 1]} : vector<8x96xf32> to vector<8x32xf32>
    %30 = vector.extract_strided_slice %26 {offsets = [0, 32], sizes = [8, 32], strides = [1, 1]} : vector<8x96xf32> to vector<8x32xf32>
    %31 = vector.extract_strided_slice %26 {offsets = [0, 64], sizes = [8, 32], strides = [1, 1]} : vector<8x96xf32> to vector<8x32xf32>
    %32 = arith.mulf %30, %17 : vector<8x32xf32>
    %33 = arith.mulf %29, %28 : vector<8x32xf32>
    %34 = arith.addf %32, %33 : vector<8x32xf32>
    %35 = math.tanh %34 : vector<8x32xf32>
    %36 = arith.mulf %31, %35 : vector<8x32xf32>
    %37 = arith.truncf %36 : vector<8x32xf32> to vector<8x32xbf16>
    %cst_13 = arith.constant dense<0.000000e+00> : vector<8x128xf32>
    %38 = tpu.matmul %37, %0, %cst_13 {dimension_numbers = #tpu.dot_dimension_numbers<[1], [0], [0], [1], [0, 0, 1, 1], [], []>} : vector<8x32xbf16>, vector<32x128xbf16>, vector<8x128xf32> -> vector<8x128xf32>
    %39 = arith.addf %9, %38 : vector<8x128xf32>
    %40 = vector.extract_strided_slice %39 {offsets = [0, 0], sizes = [8, 96], strides = [1, 1]} : vector<8x128xf32> to vector<8x96xf32>
    %41 = arith.negf %40 : vector<8x96xf32>
    %42 = math.exp %41 : vector<8x96xf32>
    %cst_14 = arith.constant 1.000000e+00 : f32
    %43 = vector.broadcast %cst_14 : f32 to vector<8x96xf32>
    %44 = arith.addf %43, %42 : vector<8x96xf32>
    %45 = arith.divf %43, %44 : vector<8x96xf32>
    %46 = vector.extract_strided_slice %39 {offsets = [0, 96], sizes = [8, 32], strides = [1, 1]} : vector<8x128xf32> to vector<8x32xf32>
    %47 = math.tanh %46 : vector<8x32xf32>
    %48 = vector.extract_strided_slice %45 {offsets = [0, 0], sizes = [8, 32], strides = [1, 1]} : vector<8x96xf32> to vector<8x32xf32>
    %49 = vector.extract_strided_slice %45 {offsets = [0, 32], sizes = [8, 32], strides = [1, 1]} : vector<8x96xf32> to vector<8x32xf32>
    %50 = vector.extract_strided_slice %45 {offsets = [0, 64], sizes = [8, 32], strides = [1, 1]} : vector<8x96xf32> to vector<8x32xf32>
    %51 = arith.mulf %49, %34 : vector<8x32xf32>
    %52 = arith.mulf %48, %47 : vector<8x32xf32>
    %53 = arith.addf %51, %52 : vector<8x32xf32>
    %54 = math.tanh %53 : vector<8x32xf32>
    %55 = arith.mulf %50, %54 : vector<8x32xf32>
    %56 = arith.truncf %55 : vector<8x32xf32> to vector<8x32xbf16>
    %cst_15 = arith.constant dense<0.000000e+00> : vector<8x128xf32>
    %57 = tpu.matmul %56, %0, %cst_15 {dimension_numbers = #tpu.dot_dimension_numbers<[1], [0], [0], [1], [0, 0, 1, 1], [], []>} : vector<8x32xbf16>, vector<32x128xbf16>, vector<8x128xf32> -> vector<8x128xf32>
    %58 = arith.addf %10, %57 : vector<8x128xf32>
    %59 = vector.extract_strided_slice %58 {offsets = [0, 0], sizes = [8, 96], strides = [1, 1]} : vector<8x128xf32> to vector<8x96xf32>
    %60 = arith.negf %59 : vector<8x96xf32>
    %61 = math.exp %60 : vector<8x96xf32>
    %cst_16 = arith.constant 1.000000e+00 : f32
    %62 = vector.broadcast %cst_16 : f32 to vector<8x96xf32>
    %63 = arith.addf %62, %61 : vector<8x96xf32>
    %64 = arith.divf %62, %63 : vector<8x96xf32>
    %65 = vector.extract_strided_slice %58 {offsets = [0, 96], sizes = [8, 32], strides = [1, 1]} : vector<8x128xf32> to vector<8x32xf32>
    %66 = math.tanh %65 : vector<8x32xf32>
    %67 = vector.extract_strided_slice %64 {offsets = [0, 0], sizes = [8, 32], strides = [1, 1]} : vector<8x96xf32> to vector<8x32xf32>
    %68 = vector.extract_strided_slice %64 {offsets = [0, 32], sizes = [8, 32], strides = [1, 1]} : vector<8x96xf32> to vector<8x32xf32>
    %69 = vector.extract_strided_slice %64 {offsets = [0, 64], sizes = [8, 32], strides = [1, 1]} : vector<8x96xf32> to vector<8x32xf32>
    %70 = arith.mulf %68, %53 : vector<8x32xf32>
    %71 = arith.mulf %67, %66 : vector<8x32xf32>
    %72 = arith.addf %70, %71 : vector<8x32xf32>
    %73 = math.tanh %72 : vector<8x32xf32>
    %74 = arith.mulf %69, %73 : vector<8x32xf32>
    %75 = arith.truncf %74 : vector<8x32xf32> to vector<8x32xbf16>
    %cst_17 = arith.constant dense<0.000000e+00> : vector<8x128xf32>
    %76 = tpu.matmul %75, %0, %cst_17 {dimension_numbers = #tpu.dot_dimension_numbers<[1], [0], [0], [1], [0, 0, 1, 1], [], []>} : vector<8x32xbf16>, vector<32x128xbf16>, vector<8x128xf32> -> vector<8x128xf32>
    %77 = arith.addf %11, %76 : vector<8x128xf32>
    %78 = vector.extract_strided_slice %77 {offsets = [0, 0], sizes = [8, 96], strides = [1, 1]} : vector<8x128xf32> to vector<8x96xf32>
    %79 = arith.negf %78 : vector<8x96xf32>
    %80 = math.exp %79 : vector<8x96xf32>
    %cst_18 = arith.constant 1.000000e+00 : f32
    %81 = vector.broadcast %cst_18 : f32 to vector<8x96xf32>
    %82 = arith.addf %81, %80 : vector<8x96xf32>
    %83 = arith.divf %81, %82 : vector<8x96xf32>
    %84 = vector.extract_strided_slice %77 {offsets = [0, 96], sizes = [8, 32], strides = [1, 1]} : vector<8x128xf32> to vector<8x32xf32>
    %85 = math.tanh %84 : vector<8x32xf32>
    %86 = vector.extract_strided_slice %83 {offsets = [0, 0], sizes = [8, 32], strides = [1, 1]} : vector<8x96xf32> to vector<8x32xf32>
    %87 = vector.extract_strided_slice %83 {offsets = [0, 32], sizes = [8, 32], strides = [1, 1]} : vector<8x96xf32> to vector<8x32xf32>
    %88 = vector.extract_strided_slice %83 {offsets = [0, 64], sizes = [8, 32], strides = [1, 1]} : vector<8x96xf32> to vector<8x32xf32>
    %89 = arith.mulf %87, %72 : vector<8x32xf32>
    %90 = arith.mulf %86, %85 : vector<8x32xf32>
    %91 = arith.addf %89, %90 : vector<8x32xf32>
    %92 = math.tanh %91 : vector<8x32xf32>
    %93 = arith.mulf %88, %92 : vector<8x32xf32>
    %94 = arith.truncf %93 : vector<8x32xf32> to vector<8x32xbf16>
    %cst_19 = arith.constant dense<0.000000e+00> : vector<8x128xf32>
    %95 = tpu.matmul %94, %0, %cst_19 {dimension_numbers = #tpu.dot_dimension_numbers<[1], [0], [0], [1], [0, 0, 1, 1], [], []>} : vector<8x32xbf16>, vector<32x128xbf16>, vector<8x128xf32> -> vector<8x128xf32>
    %96 = arith.addf %12, %95 : vector<8x128xf32>
    %97 = vector.extract_strided_slice %96 {offsets = [0, 0], sizes = [8, 96], strides = [1, 1]} : vector<8x128xf32> to vector<8x96xf32>
    %98 = arith.negf %97 : vector<8x96xf32>
    %99 = math.exp %98 : vector<8x96xf32>
    %cst_20 = arith.constant 1.000000e+00 : f32
    %100 = vector.broadcast %cst_20 : f32 to vector<8x96xf32>
    %101 = arith.addf %100, %99 : vector<8x96xf32>
    %102 = arith.divf %100, %101 : vector<8x96xf32>
    %103 = vector.extract_strided_slice %96 {offsets = [0, 96], sizes = [8, 32], strides = [1, 1]} : vector<8x128xf32> to vector<8x32xf32>
    %104 = math.tanh %103 : vector<8x32xf32>
    %105 = vector.extract_strided_slice %102 {offsets = [0, 0], sizes = [8, 32], strides = [1, 1]} : vector<8x96xf32> to vector<8x32xf32>
    %106 = vector.extract_strided_slice %102 {offsets = [0, 32], sizes = [8, 32], strides = [1, 1]} : vector<8x96xf32> to vector<8x32xf32>
    %107 = vector.extract_strided_slice %102 {offsets = [0, 64], sizes = [8, 32], strides = [1, 1]} : vector<8x96xf32> to vector<8x32xf32>
    %108 = arith.mulf %106, %91 : vector<8x32xf32>
    %109 = arith.mulf %105, %104 : vector<8x32xf32>
    %110 = arith.addf %108, %109 : vector<8x32xf32>
    %111 = math.tanh %110 : vector<8x32xf32>
    %112 = arith.mulf %107, %111 : vector<8x32xf32>
    %113 = arith.truncf %112 : vector<8x32xf32> to vector<8x32xbf16>
    %cst_21 = arith.constant dense<0.000000e+00> : vector<8x128xf32>
    %114 = tpu.matmul %113, %0, %cst_21 {dimension_numbers = #tpu.dot_dimension_numbers<[1], [0], [0], [1], [0, 0, 1, 1], [], []>} : vector<8x32xbf16>, vector<32x128xbf16>, vector<8x128xf32> -> vector<8x128xf32>
    %115 = arith.addf %13, %114 : vector<8x128xf32>
    %116 = vector.extract_strided_slice %115 {offsets = [0, 0], sizes = [8, 96], strides = [1, 1]} : vector<8x128xf32> to vector<8x96xf32>
    %117 = arith.negf %116 : vector<8x96xf32>
    %118 = math.exp %117 : vector<8x96xf32>
    %cst_22 = arith.constant 1.000000e+00 : f32
    %119 = vector.broadcast %cst_22 : f32 to vector<8x96xf32>
    %120 = arith.addf %119, %118 : vector<8x96xf32>
    %121 = arith.divf %119, %120 : vector<8x96xf32>
    %122 = vector.extract_strided_slice %115 {offsets = [0, 96], sizes = [8, 32], strides = [1, 1]} : vector<8x128xf32> to vector<8x32xf32>
    %123 = math.tanh %122 : vector<8x32xf32>
    %124 = vector.extract_strided_slice %121 {offsets = [0, 0], sizes = [8, 32], strides = [1, 1]} : vector<8x96xf32> to vector<8x32xf32>
    %125 = vector.extract_strided_slice %121 {offsets = [0, 32], sizes = [8, 32], strides = [1, 1]} : vector<8x96xf32> to vector<8x32xf32>
    %126 = vector.extract_strided_slice %121 {offsets = [0, 64], sizes = [8, 32], strides = [1, 1]} : vector<8x96xf32> to vector<8x32xf32>
    %127 = arith.mulf %125, %110 : vector<8x32xf32>
    %128 = arith.mulf %124, %123 : vector<8x32xf32>
    %129 = arith.addf %127, %128 : vector<8x32xf32>
    %130 = math.tanh %129 : vector<8x32xf32>
    %131 = arith.mulf %126, %130 : vector<8x32xf32>
    %132 = arith.truncf %131 : vector<8x32xf32> to vector<8x32xbf16>
    %cst_23 = arith.constant dense<0.000000e+00> : vector<8x128xf32>
    %133 = tpu.matmul %132, %0, %cst_23 {dimension_numbers = #tpu.dot_dimension_numbers<[1], [0], [0], [1], [0, 0, 1, 1], [], []>} : vector<8x32xbf16>, vector<32x128xbf16>, vector<8x128xf32> -> vector<8x128xf32>
    %134 = arith.addf %14, %133 : vector<8x128xf32>
    %135 = vector.extract_strided_slice %134 {offsets = [0, 0], sizes = [8, 96], strides = [1, 1]} : vector<8x128xf32> to vector<8x96xf32>
    %136 = arith.negf %135 : vector<8x96xf32>
    %137 = math.exp %136 : vector<8x96xf32>
    %cst_24 = arith.constant 1.000000e+00 : f32
    %138 = vector.broadcast %cst_24 : f32 to vector<8x96xf32>
    %139 = arith.addf %138, %137 : vector<8x96xf32>
    %140 = arith.divf %138, %139 : vector<8x96xf32>
    %141 = vector.extract_strided_slice %134 {offsets = [0, 96], sizes = [8, 32], strides = [1, 1]} : vector<8x128xf32> to vector<8x32xf32>
    %142 = math.tanh %141 : vector<8x32xf32>
    %143 = vector.extract_strided_slice %140 {offsets = [0, 0], sizes = [8, 32], strides = [1, 1]} : vector<8x96xf32> to vector<8x32xf32>
    %144 = vector.extract_strided_slice %140 {offsets = [0, 32], sizes = [8, 32], strides = [1, 1]} : vector<8x96xf32> to vector<8x32xf32>
    %145 = vector.extract_strided_slice %140 {offsets = [0, 64], sizes = [8, 32], strides = [1, 1]} : vector<8x96xf32> to vector<8x32xf32>
    %146 = arith.mulf %144, %129 : vector<8x32xf32>
    %147 = arith.mulf %143, %142 : vector<8x32xf32>
    %148 = arith.addf %146, %147 : vector<8x32xf32>
    %149 = math.tanh %148 : vector<8x32xf32>
    %150 = arith.mulf %145, %149 : vector<8x32xf32>
    %151 = arith.truncf %150 : vector<8x32xf32> to vector<8x32xbf16>
    %cst_25 = arith.constant dense<0.000000e+00> : vector<8x128xf32>
    %152 = tpu.matmul %151, %0, %cst_25 {dimension_numbers = #tpu.dot_dimension_numbers<[1], [0], [0], [1], [0, 0, 1, 1], [], []>} : vector<8x32xbf16>, vector<32x128xbf16>, vector<8x128xf32> -> vector<8x128xf32>
    %153 = arith.addf %15, %152 : vector<8x128xf32>
    %154 = vector.extract_strided_slice %153 {offsets = [0, 0], sizes = [8, 96], strides = [1, 1]} : vector<8x128xf32> to vector<8x96xf32>
    %155 = arith.negf %154 : vector<8x96xf32>
    %156 = math.exp %155 : vector<8x96xf32>
    %cst_26 = arith.constant 1.000000e+00 : f32
    %157 = vector.broadcast %cst_26 : f32 to vector<8x96xf32>
    %158 = arith.addf %157, %156 : vector<8x96xf32>
    %159 = arith.divf %157, %158 : vector<8x96xf32>
    %160 = vector.extract_strided_slice %153 {offsets = [0, 96], sizes = [8, 32], strides = [1, 1]} : vector<8x128xf32> to vector<8x32xf32>
    %161 = math.tanh %160 : vector<8x32xf32>
    %162 = vector.extract_strided_slice %159 {offsets = [0, 0], sizes = [8, 32], strides = [1, 1]} : vector<8x96xf32> to vector<8x32xf32>
    %163 = vector.extract_strided_slice %159 {offsets = [0, 32], sizes = [8, 32], strides = [1, 1]} : vector<8x96xf32> to vector<8x32xf32>
    %164 = vector.extract_strided_slice %159 {offsets = [0, 64], sizes = [8, 32], strides = [1, 1]} : vector<8x96xf32> to vector<8x32xf32>
    %165 = arith.mulf %163, %148 : vector<8x32xf32>
    %166 = arith.mulf %162, %161 : vector<8x32xf32>
    %167 = arith.addf %165, %166 : vector<8x32xf32>
    %168 = math.tanh %167 : vector<8x32xf32>
    %169 = arith.mulf %164, %168 : vector<8x32xf32>
    %c0_27 = arith.constant 0 : index
    %c0_28 = arith.constant 0 : index
    %170 = vector.load %arg5[%c0_27, %c0_28] : memref<1x128xf32, #tpu.memory_space<vmem>>, vector<1x128xf32>
    %171 = arith.truncf %169 : vector<8x32xf32> to vector<8x32xbf16>
    %cst_29 = arith.constant dense<0.000000e+00> : vector<8x128xf32>
    %172 = tpu.matmul %171, %1, %cst_29 {dimension_numbers = #tpu.dot_dimension_numbers<[1], [0], [0], [1], [0, 0, 1, 1], [], []>} : vector<8x32xbf16>, vector<32x128xbf16>, vector<8x128xf32> -> vector<8x128xf32>
    %173 = vector.broadcast %170 : vector<1x128xf32> to vector<8x128xf32>
    %174 = arith.addf %173, %172 : vector<8x128xf32>
    %175 = vector.extract_strided_slice %174 {offsets = [0, 0], sizes = [8, 96], strides = [1, 1]} : vector<8x128xf32> to vector<8x96xf32>
    %176 = arith.negf %175 : vector<8x96xf32>
    %177 = math.exp %176 : vector<8x96xf32>
    %cst_30 = arith.constant 1.000000e+00 : f32
    %178 = vector.broadcast %cst_30 : f32 to vector<8x96xf32>
    %179 = arith.addf %178, %177 : vector<8x96xf32>
    %180 = arith.divf %178, %179 : vector<8x96xf32>
    %181 = vector.extract_strided_slice %174 {offsets = [0, 96], sizes = [8, 32], strides = [1, 1]} : vector<8x128xf32> to vector<8x32xf32>
    %182 = math.tanh %181 : vector<8x32xf32>
    %183 = vector.extract_strided_slice %180 {offsets = [0, 0], sizes = [8, 32], strides = [1, 1]} : vector<8x96xf32> to vector<8x32xf32>
    %184 = vector.extract_strided_slice %180 {offsets = [0, 32], sizes = [8, 32], strides = [1, 1]} : vector<8x96xf32> to vector<8x32xf32>
    %185 = vector.extract_strided_slice %180 {offsets = [0, 64], sizes = [8, 32], strides = [1, 1]} : vector<8x96xf32> to vector<8x32xf32>
    %186 = arith.mulf %184, %167 : vector<8x32xf32>
    %187 = arith.mulf %183, %182 : vector<8x32xf32>
    %188 = arith.addf %186, %187 : vector<8x32xf32>
    %189 = math.tanh %188 : vector<8x32xf32>
    %190 = arith.mulf %185, %189 : vector<8x32xf32>
    %c0_31 = arith.constant 0 : index
    %c0_32 = arith.constant 0 : index
    %c0_33 = arith.constant 0 : index
    %191 = vector.load %arg6[%c0_31, %c0_32, %c0_33] : memref<4x8x32xf32, #tpu.memory_space<vmem>>, vector<1x8x32xf32>
    %192 = vector.shape_cast %191 : vector<1x8x32xf32> to vector<8x32xf32>
    %193 = vector.shape_cast %190 : vector<8x32xf32> to vector<1x8x32xf32>
    tpu.vector_store %arg6[%c0_31, %c0_32, %c0_33], %193 {strides = array<i32>} : memref<4x8x32xf32, #tpu.memory_space<vmem>>, vector<1x8x32xf32>,
    %194 = arith.truncf %190 : vector<8x32xf32> to vector<8x32xbf16>
    %cst_34 = arith.constant dense<0.000000e+00> : vector<8x128xf32>
    %195 = tpu.matmul %194, %1, %cst_34 {dimension_numbers = #tpu.dot_dimension_numbers<[1], [0], [0], [1], [0, 0, 1, 1], [], []>} : vector<8x32xbf16>, vector<32x128xbf16>, vector<8x128xf32> -> vector<8x128xf32>
    %196 = vector.broadcast %170 : vector<1x128xf32> to vector<8x128xf32>
    %197 = arith.addf %196, %195 : vector<8x128xf32>
    %198 = vector.extract_strided_slice %197 {offsets = [0, 0], sizes = [8, 96], strides = [1, 1]} : vector<8x128xf32> to vector<8x96xf32>
    %199 = arith.negf %198 : vector<8x96xf32>
    %200 = math.exp %199 : vector<8x96xf32>
    %cst_35 = arith.constant 1.000000e+00 : f32
    %201 = vector.broadcast %cst_35 : f32 to vector<8x96xf32>
    %202 = arith.addf %201, %200 : vector<8x96xf32>
    %203 = arith.divf %201, %202 : vector<8x96xf32>
    %204 = vector.extract_strided_slice %197 {offsets = [0, 96], sizes = [8, 32], strides = [1, 1]} : vector<8x128xf32> to vector<8x32xf32>
    %205 = math.tanh %204 : vector<8x32xf32>
    %206 = vector.extract_strided_slice %203 {offsets = [0, 0], sizes = [8, 32], strides = [1, 1]} : vector<8x96xf32> to vector<8x32xf32>
    %207 = vector.extract_strided_slice %203 {offsets = [0, 32], sizes = [8, 32], strides = [1, 1]} : vector<8x96xf32> to vector<8x32xf32>
    %208 = vector.extract_strided_slice %203 {offsets = [0, 64], sizes = [8, 32], strides = [1, 1]} : vector<8x96xf32> to vector<8x32xf32>
    %209 = arith.mulf %207, %188 : vector<8x32xf32>
    %210 = arith.mulf %206, %205 : vector<8x32xf32>
    %211 = arith.addf %209, %210 : vector<8x32xf32>
    %212 = math.tanh %211 : vector<8x32xf32>
    %213 = arith.mulf %208, %212 : vector<8x32xf32>
    %c1 = arith.constant 1 : index
    %c0_36 = arith.constant 0 : index
    %c0_37 = arith.constant 0 : index
    %214 = vector.load %arg6[%c1, %c0_36, %c0_37] : memref<4x8x32xf32, #tpu.memory_space<vmem>>, vector<1x8x32xf32>
    %215 = vector.shape_cast %214 : vector<1x8x32xf32> to vector<8x32xf32>
    %216 = vector.shape_cast %213 : vector<8x32xf32> to vector<1x8x32xf32>
    tpu.vector_store %arg6[%c1, %c0_36, %c0_37], %216 {strides = array<i32>} : memref<4x8x32xf32, #tpu.memory_space<vmem>>, vector<1x8x32xf32>,
    %217 = arith.truncf %213 : vector<8x32xf32> to vector<8x32xbf16>
    %cst_38 = arith.constant dense<0.000000e+00> : vector<8x128xf32>
    %218 = tpu.matmul %217, %1, %cst_38 {dimension_numbers = #tpu.dot_dimension_numbers<[1], [0], [0], [1], [0, 0, 1, 1], [], []>} : vector<8x32xbf16>, vector<32x128xbf16>, vector<8x128xf32> -> vector<8x128xf32>
    %219 = vector.broadcast %170 : vector<1x128xf32> to vector<8x128xf32>
    %220 = arith.addf %219, %218 : vector<8x128xf32>
    %221 = vector.extract_strided_slice %220 {offsets = [0, 0], sizes = [8, 96], strides = [1, 1]} : vector<8x128xf32> to vector<8x96xf32>
    %222 = arith.negf %221 : vector<8x96xf32>
    %223 = math.exp %222 : vector<8x96xf32>
    %cst_39 = arith.constant 1.000000e+00 : f32
    %224 = vector.broadcast %cst_39 : f32 to vector<8x96xf32>
    %225 = arith.addf %224, %223 : vector<8x96xf32>
    %226 = arith.divf %224, %225 : vector<8x96xf32>
    %227 = vector.extract_strided_slice %220 {offsets = [0, 96], sizes = [8, 32], strides = [1, 1]} : vector<8x128xf32> to vector<8x32xf32>
    %228 = math.tanh %227 : vector<8x32xf32>
    %229 = vector.extract_strided_slice %226 {offsets = [0, 0], sizes = [8, 32], strides = [1, 1]} : vector<8x96xf32> to vector<8x32xf32>
    %230 = vector.extract_strided_slice %226 {offsets = [0, 32], sizes = [8, 32], strides = [1, 1]} : vector<8x96xf32> to vector<8x32xf32>
    %231 = vector.extract_strided_slice %226 {offsets = [0, 64], sizes = [8, 32], strides = [1, 1]} : vector<8x96xf32> to vector<8x32xf32>
    %232 = arith.mulf %230, %211 : vector<8x32xf32>
    %233 = arith.mulf %229, %228 : vector<8x32xf32>
    %234 = arith.addf %232, %233 : vector<8x32xf32>
    %235 = math.tanh %234 : vector<8x32xf32>
    %236 = arith.mulf %231, %235 : vector<8x32xf32>
    %c2 = arith.constant 2 : index
    %c0_40 = arith.constant 0 : index
    %c0_41 = arith.constant 0 : index
    %237 = vector.load %arg6[%c2, %c0_40, %c0_41] : memref<4x8x32xf32, #tpu.memory_space<vmem>>, vector<1x8x32xf32>
    %238 = vector.shape_cast %237 : vector<1x8x32xf32> to vector<8x32xf32>
    %239 = vector.shape_cast %236 : vector<8x32xf32> to vector<1x8x32xf32>
    tpu.vector_store %arg6[%c2, %c0_40, %c0_41], %239 {strides = array<i32>} : memref<4x8x32xf32, #tpu.memory_space<vmem>>, vector<1x8x32xf32>,
    %240 = arith.truncf %236 : vector<8x32xf32> to vector<8x32xbf16>
    %cst_42 = arith.constant dense<0.000000e+00> : vector<8x128xf32>
    %241 = tpu.matmul %240, %1, %cst_42 {dimension_numbers = #tpu.dot_dimension_numbers<[1], [0], [0], [1], [0, 0, 1, 1], [], []>} : vector<8x32xbf16>, vector<32x128xbf16>, vector<8x128xf32> -> vector<8x128xf32>
    %242 = vector.broadcast %170 : vector<1x128xf32> to vector<8x128xf32>
    %243 = arith.addf %242, %241 : vector<8x128xf32>
    %244 = vector.extract_strided_slice %243 {offsets = [0, 0], sizes = [8, 96], strides = [1, 1]} : vector<8x128xf32> to vector<8x96xf32>
    %245 = arith.negf %244 : vector<8x96xf32>
    %246 = math.exp %245 : vector<8x96xf32>
    %cst_43 = arith.constant 1.000000e+00 : f32
    %247 = vector.broadcast %cst_43 : f32 to vector<8x96xf32>
    %248 = arith.addf %247, %246 : vector<8x96xf32>
    %249 = arith.divf %247, %248 : vector<8x96xf32>
    %250 = vector.extract_strided_slice %243 {offsets = [0, 96], sizes = [8, 32], strides = [1, 1]} : vector<8x128xf32> to vector<8x32xf32>
    %251 = math.tanh %250 : vector<8x32xf32>
    %252 = vector.extract_strided_slice %249 {offsets = [0, 0], sizes = [8, 32], strides = [1, 1]} : vector<8x96xf32> to vector<8x32xf32>
    %253 = vector.extract_strided_slice %249 {offsets = [0, 32], sizes = [8, 32], strides = [1, 1]} : vector<8x96xf32> to vector<8x32xf32>
    %254 = vector.extract_strided_slice %249 {offsets = [0, 64], sizes = [8, 32], strides = [1, 1]} : vector<8x96xf32> to vector<8x32xf32>
    %255 = arith.mulf %253, %234 : vector<8x32xf32>
    %256 = arith.mulf %252, %251 : vector<8x32xf32>
    %257 = arith.addf %255, %256 : vector<8x32xf32>
    %258 = math.tanh %257 : vector<8x32xf32>
    %259 = arith.mulf %254, %258 : vector<8x32xf32>
    %c3 = arith.constant 3 : index
    %c0_44 = arith.constant 0 : index
    %c0_45 = arith.constant 0 : index
    %260 = vector.load %arg6[%c3, %c0_44, %c0_45] : memref<4x8x32xf32, #tpu.memory_space<vmem>>, vector<1x8x32xf32>
    %261 = vector.shape_cast %260 : vector<1x8x32xf32> to vector<8x32xf32>
    %262 = vector.shape_cast %259 : vector<8x32xf32> to vector<1x8x32xf32>
    tpu.vector_store %arg6[%c3, %c0_44, %c0_45], %262 {strides = array<i32>} : memref<4x8x32xf32, #tpu.memory_space<vmem>>, vector<1x8x32xf32>,
    return
  }
}

</mosaic_0001>

<bundles_post_ra>
// kernel: eda_forward.1
= control target key start
LH: loop header
LB: loop body
LE: loop exit
PB: predicated region body
PF: predicated region fallthrough
CT: control target
= control target key end

     0   :  { %vm80_vm0 = vcmask 261120   ;;  %v1050_v5 = vmov 0   ;;  %s1051_s7 = smov 32   ;;  %s1252_s1 = inlined_call_operand.vmem [shape: bf16[32,128], index: 1, kind: input, shape index: {}]   ;;  %s1253_s3 = inlined_call_operand.vmem [shape: bf16[32,128], index: 3, kind: input, shape index: {}]   ;;  %s1254_s2 = inlined_call_operand.vmem [shape: f32[1,128], index: 2, kind: input, shape index: {}]   ;;  %s1255_s0 = inlined_call_operand.vmem [shape: bf16[64,32], index: 0, kind: input, shape index: {}]   ;;  %s1256_s4 = inlined_call_operand.vmem [shape: bf16[32,128], index: 4, kind: input, shape index: {}]   ;;  %s1257_s5 = inlined_call_operand.vmem [shape: f32[1,128], index: 5, kind: input, shape index: {}]   ;;  %s1258_s6 = inlined_call_operand.vmem [shape: f32[4,8,32], index: 6, kind: output, shape index: {}]  }
   0x1   :  { %v948_v0 = vld [vmem:[%s1252_s1 + $0x8] sm:$0xff]  ;;  %v947_v2 = vld [vmem:[%s1252_s1] sm:$0xff] }
   0x2   :  { %v1094_v1 = vld [vmem:[%s1253_s3 + $0x8] sm:$0xff]  ;;  %99 = vmatpush.bf16.msra.mxu0 %v948_v0  ;;  %v1103_v3 = vld [vmem:[%s1253_s3] sm:$0xff] }
   0x3   :  { %143 = vmatpush.bf16.msra.mxu1 %v1094_v1  ;;  %201 = vmatpush.bf16.msra.mxu2 %v1094_v1  ;;  %v943_v4 = vld [vmem:[%s1255_s0] sm:$0xff]  ;;  %v944_v61 = vld [vmem:[%s1255_s0 + $0x8] sm:$0xff] }
   0x4   :  { %259 = vmatpush.bf16.msra.mxu3 %v1094_v1  ;;  %v1125_v6 = vld [vmem:[%s1254_s2] ss:$0 sm:$0xff]  ;;  %s1052_s2 = smov 64  }
   0x6   :  { %100 = vmatpush.bf16.msra.mxu0 %v947_v2 }
   0x7   :  { %144 = vmatpush.bf16.msra.mxu1 %v1103_v3  ;;  %202 = vmatpush.bf16.msra.mxu2 %v1103_v3 }
   0x8   :  { %260 = vmatpush.bf16.msra.mxu3 %v1103_v3 }
   0x9   :  { %893 = vmatmul.msk.bf16.vlgmr.msra.gmra.mxu0 %vm80_vm0, %v943_v4 }
   0xa   :  { %145 = vmatmul.bf16.vlgmr.msra.gmra.mxu1 %v1050_v5 }
   0xb   :  { %317 = vmatpush.bf16.msrb.mxu1 %v1094_v1  ;;  %375 = vmatpush.bf16.msrb.mxu2 %v1094_v1 }
   0xc   :  { %433 = vmatpush.bf16.msrb.mxu3 %v1094_v1 }
   0xf   :  { %318 = vmatpush.bf16.msrb.mxu1 %v1103_v3  ;;  %376 = vmatpush.bf16.msrb.mxu2 %v1103_v3 }
  0x10   :  { %434 = vmatpush.bf16.msrb.mxu3 %v1103_v3 }
  0x13   :  { %491 = vmatpush.bf16.msra.mxu1 %v1094_v1 }
  0x17   :  { %492 = vmatpush.bf16.msra.mxu1 %v1103_v3 }
  0x19   :  { %894 = vmatmul.msk.bf16.gmra.mxu0 %vm80_vm0, %v944_v61 }
  0x86   :  { %v102_v7 = vpop.f32.mrf.mxu0 }
  0x87   :  { %v146_v8 = vpop.f32.mrf.mxu1  ;;  %v103_v9 = vadd.f32 %v1125_v6, %v102_v7 }
  0x89   :  { %v150_v10 = vadd.f32 %v146_v8, %v103_v9 }
  0x8b   :  { %954 = vtanh.f32 %v150_v10  ;;  %v905_v13 = vmul.f32 -1.442695, %v150_v10 }
  0x8d   :  { %956 = vpow2.f32 %v905_v13 }
  0x8e   :  { %v104_v36 = vpop.f32.mrf.mxu0 }
  0x8f   :  { %v148_v11 = vpop.f32.mrf.mxu1  ;;  %v105_v37 = vadd.f32 %v1125_v6, %v104_v36 }
  0x91   :  { %v955_v12 = vpop.eup %954 }
  0x92   :  { %173 = vrot.lane.b32.xlu0 %v955_v12, %s1051_s7 }
  0x93   :  { %v957_v14 = vpop.eup %956 }
  0x94   :  { %v154_v15 = vadd.f32 1.0, %v957_v14 }
  0x96   :  { %958 = vrcp.f32 %v154_v15  ;;  %v166_v21 = vand.u32 2147483648, %v154_v15  ;;  %vm160_vm2 = vweird.f32 %v154_v15  ;;  %v164_v22 = vand.u32 2147483647, %v154_v15  ;;  %v107_v2 = vpop.f32.mrf.mxu0 }
  0x98   :  { %v167_v24 = vor.u32 1.1754944e-38, %v166_v21  ;;  %vm165_vm4 = vcmp.eq.f32.partialorder %v164_v22, 8.507059e+37 }
  0x9c   :  { %v959_v16 = vpop.eup %958 }
  0x9d   :  { %v156_v17 = vmul.f32 %v959_v16, %v154_v15  ;;  %vm161_vm1 = vweird.f32 %v959_v16 }
  0x9e   :  { %vm162_vm3 = vmor %vm160_vm2, %vm161_vm1 }
  0x9f   :  { %v157_v18 = vsub.f32 1.0, %v156_v17 }
  0xa1   :  { %v158_v19 = vmul.f32 %v959_v16, %v157_v18 }
  0xa3   :  { %v159_v20 = vadd.f32 %v959_v16, %v158_v19 }
  0xa5   :  { %v163_v23 = vsel %vm162_vm3, %v959_v16, %v159_v20 }
  0xa6   :  { %v168_v26 = vsel %vm165_vm4, %v167_v24, %v163_v23 }
  0xa7   :  { %v171_v28 = vmul.f32 0.0, %v168_v26 }
 0x104   :  { %v174_v25 = vpop.permute.xlu0 %173 }
 0x105   :  { %v176_v27 = vmul.f32 %v174_v25, %v168_v26 }
 0x107   :  { %178 = vrot.lane.b32.xlu0 %v176_v27, %s1051_s7 }
 0x179   :  { %v179_v29 = vpop.permute.xlu0 %178 }
 0x17a   :  { %v181_v30 = vadd.f32 %v179_v29, %v171_v28 }
 0x17c   :  { %960 = vtanh.f32 %v181_v30 }
 0x182   :  { %v961_v31 = vpop.eup %960 }
 0x183   :  { %184 = vrot.lane.b32.xlu1 %v961_v31, %s1051_s7 }
 0x1f5   :  { %v185_v32 = vpop.permute.xlu1 %184 }
 0x1f6   :  { %v187_v33 = vmul.f32 %v185_v32, %v168_v26  ;;  %v109_v32 = vpop.f32.mrf.mxu0 }
 0x1f8   :  { %v188_v34 = vpack.c.bf16 %v187_v33, %v187_v33  ;;  %v110_v33 = vadd.f32 %v1125_v6, %v109_v32 }
 0x1fa   :  { %190 = vrot.lane.b32.xlu1 %v188_v34, %s1052_s2 }
 0x26c   :  { %v191_v35 = vpop.permute.xlu1 %190 }
 0x26d   :  { %906 = vmatmul.msk.bf16.vlgmr.msra.gmra.mxu2 %vm80_vm0, %v191_v35 }
 0x26e   :  { %549 = vmatpush.bf16.msra.mxu2 %v1094_v1 }
 0x272   :  { %550 = vmatpush.bf16.msra.mxu2 %v1103_v3  ;;  %v108_v3 = vadd.f32 %v1125_v6, %v107_v2 }
 0x2f0   :  { %v204_v38 = vpop.f32.mrf.mxu2 }
 0x2f1   :  { %v208_v39 = vadd.f32 %v204_v38, %v105_v37 }
 0x2f3   :  { %962 = vtanh.f32 %v208_v39  ;;  %v907_v42 = vmul.f32 -1.442695, %v208_v39 }
 0x2f5   :  { %964 = vpow2.f32 %v907_v42 }
 0x2f8   :  { %v206_v40 = vpop.f32.mrf.mxu2 }
 0x2f9   :  { %v963_v41 = vpop.eup %962 }
 0x2fa   :  { %231 = vrot.lane.b32.xlu2 %v963_v41, %s1051_s7 }
 0x2fb   :  { %v965_v43 = vpop.eup %964 }
 0x2fc   :  { %v212_v44 = vadd.f32 1.0, %v965_v43 }
 0x2fe   :  { %966 = vrcp.f32 %v212_v44  ;;  %v224_v50 = vand.u32 2147483648, %v212_v44  ;;  %vm218_vm6 = vweird.f32 %v212_v44  ;;  %v222_v51 = vand.u32 2147483647, %v212_v44 }
 0x300   :  { %v225_v53 = vor.u32 1.1754944e-38, %v224_v50  ;;  %vm223_vm8 = vcmp.eq.f32.partialorder %v222_v51, 8.507059e+37 }
 0x304   :  { %v967_v45 = vpop.eup %966 }
 0x305   :  { %v214_v46 = vmul.f32 %v967_v45, %v212_v44  ;;  %vm219_vm5 = vweird.f32 %v967_v45 }
 0x306   :  { %vm220_vm7 = vmor %vm218_vm6, %vm219_vm5 }
 0x307   :  { %v215_v47 = vsub.f32 1.0, %v214_v46 }
 0x309   :  { %v216_v48 = vmul.f32 %v967_v45, %v215_v47 }
 0x30b   :  { %v217_v49 = vadd.f32 %v967_v45, %v216_v48 }
 0x30d   :  { %v221_v52 = vsel %vm220_vm7, %v967_v45, %v217_v49 }
 0x30e   :  { %v226_v55 = vsel %vm223_vm8, %v225_v53, %v221_v52 }
 0x30f   :  { %v229_v57 = vmul.f32 %v226_v55, %v181_v30 }
 0x354   :  { %v232_v54 = vpop.permute.xlu2 %231 }
 0x355   :  { %v234_v56 = vmul.f32 %v232_v54, %v226_v55 }
 0x357   :  { %236 = vrot.lane.b32.xlu2 %v234_v56, %s1051_s7 }
 0x3b1   :  { %v237_v58 = vpop.permute.xlu2 %236 }
 0x3b2   :  { %v239_v59 = vadd.f32 %v237_v58, %v229_v57  ;;  %v945_v57 = vld [vmem:[%s1255_s0 + $0x10] sm:$0xff] }
 0x3b3   :  { %895 = vmatmul.msk.bf16.gmra.mxu0 %vm80_vm0, %v945_v57 }
 0x3b4   :  { %968 = vtanh.f32 %v239_v59 }
 0x3ba   :  { %v969_v60 = vpop.eup %968 }
 0x3bb   :  { %242 = vrot.lane.b32.xlu0 %v969_v60, %s1051_s7 }
 0x42d   :  { %v243_v62 = vpop.permute.xlu0 %242 }
 0x42e   :  { %v245_v63 = vmul.f32 %v243_v62, %v226_v55 }
 0x430   :  { %v246_v0 = vpack.c.bf16 %v245_v63, %v245_v63  ;;  %v112_v62 = vpop.f32.mrf.mxu0 }
 0x431   :  { %v113_v63 = vadd.f32 %v1125_v6, %v112_v62 }
 0x432   :  { %248 = vrot.lane.b32.xlu1 %v246_v0, %s1052_s2 }
 0x4a4   :  { %v249_v1 = vpop.permute.xlu1 %248 }
 0x4a5   :  { %908 = vmatmul.msk.bf16.vlgmr.msra.gmra.mxu3 %vm80_vm0, %v249_v1 }
 0x528   :  { %v262_v4 = vpop.f32.mrf.mxu3 }
 0x529   :  { %v266_v5 = vadd.f32 %v262_v4, %v108_v3 }
 0x52b   :  { %970 = vtanh.f32 %v266_v5  ;;  %v909_v9 = vmul.f32 -1.442695, %v266_v5 }
 0x52d   :  { %972 = vpow2.f32 %v909_v9 }
 0x530   :  { %v264_v7 = vpop.f32.mrf.mxu3 }
 0x531   :  { %v971_v8 = vpop.eup %970 }
 0x532   :  { %289 = vrot.lane.b32.xlu2 %v971_v8, %s1051_s7 }
 0x533   :  { %v973_v10 = vpop.eup %972 }
 0x534   :  { %v270_v11 = vadd.f32 1.0, %v973_v10 }
 0x536   :  { %974 = vrcp.f32 %v270_v11  ;;  %v282_v17 = vand.u32 2147483648, %v270_v11  ;;  %vm276_vm10 = vweird.f32 %v270_v11  ;;  %v280_v18 = vand.u32 2147483647, %v270_v11 }
 0x538   :  { %v283_v20 = vor.u32 1.1754944e-38, %v282_v17  ;;  %vm281_vm12 = vcmp.eq.f32.partialorder %v280_v18, 8.507059e+37 }
 0x53c   :  { %v975_v12 = vpop.eup %974 }
 0x53d   :  { %v272_v13 = vmul.f32 %v975_v12, %v270_v11  ;;  %vm277_vm9 = vweird.f32 %v975_v12 }
 0x53e   :  { %vm278_vm11 = vmor %vm276_vm10, %vm277_vm9 }
 0x53f   :  { %v273_v14 = vsub.f32 1.0, %v272_v13 }
 0x541   :  { %v274_v15 = vmul.f32 %v975_v12, %v273_v14 }
 0x543   :  { %v275_v16 = vadd.f32 %v975_v12, %v274_v15 }
 0x545   :  { %v279_v19 = vsel %vm278_vm11, %v975_v12, %v275_v16 }
 0x546   :  { %v284_v22 = vsel %vm281_vm12, %v283_v20, %v279_v19 }
 0x547   :  { %v287_v24 = vmul.f32 %v284_v22, %v239_v59 }
 0x58c   :  { %v290_v21 = vpop.permute.xlu2 %289 }
 0x58d   :  { %v292_v23 = vmul.f32 %v290_v21, %v284_v22 }
 0x58f   :  { %294 = vrot.lane.b32.xlu0 %v292_v23, %s1051_s7 }
 0x601   :  { %v295_v25 = vpop.permute.xlu0 %294 }
 0x602   :  { %v297_v26 = vadd.f32 %v295_v25, %v287_v24 }
 0x604   :  { %976 = vtanh.f32 %v297_v26 }
 0x60a   :  { %v977_v27 = vpop.eup %976 }
 0x60b   :  { %300 = vrot.lane.b32.xlu1 %v977_v27, %s1051_s7 }
 0x67d   :  { %v301_v28 = vpop.permute.xlu1 %300 }
 0x67e   :  { %v303_v29 = vmul.f32 %v301_v28, %v284_v22  ;;  %v114_v28 = vpop.f32.mrf.mxu0 }
 0x680   :  { %v304_v30 = vpack.c.bf16 %v303_v29, %v303_v29  ;;  %v115_v29 = vadd.f32 %v1125_v6, %v114_v28 }
 0x682   :  { %306 = vrot.lane.b32.xlu2 %v304_v30, %s1052_s2 }
 0x6dc   :  { %v307_v31 = vpop.permute.xlu2 %306 }
 0x6dd   :  { %910 = vmatmul.msk.bf16.vlgmr.msrb.gmra.mxu1 %vm80_vm0, %v307_v31 }
 0x75a   :  { %v320_v34 = vpop.f32.mrf.mxu1 }
 0x75b   :  { %v324_v35 = vadd.f32 %v320_v34, %v110_v33 }
 0x75d   :  { %978 = vtanh.f32 %v324_v35  ;;  %v911_v38 = vmul.f32 -1.442695, %v324_v35 }
 0x75f   :  { %980 = vpow2.f32 %v911_v38 }
 0x762   :  { %v322_v36 = vpop.f32.mrf.mxu1 }
 0x763   :  { %v979_v37 = vpop.eup %978 }
 0x764   :  { %347 = vrot.lane.b32.xlu0 %v979_v37, %s1051_s7 }
 0x765   :  { %v981_v39 = vpop.eup %980 }
 0x766   :  { %v328_v40 = vadd.f32 1.0, %v981_v39 }
 0x768   :  { %982 = vrcp.f32 %v328_v40  ;;  %v340_v46 = vand.u32 2147483648, %v328_v40  ;;  %vm334_vm14 = vweird.f32 %v328_v40  ;;  %v338_v47 = vand.u32 2147483647, %v328_v40 }
 0x76a   :  { %v341_v49 = vor.u32 1.1754944e-38, %v340_v46  ;;  %vm339_vm1 = vcmp.eq.f32.partialorder %v338_v47, 8.507059e+37 }
 0x76e   :  { %v983_v41 = vpop.eup %982 }
 0x76f   :  { %v330_v42 = vmul.f32 %v983_v41, %v328_v40  ;;  %vm335_vm13 = vweird.f32 %v983_v41 }
 0x770   :  { %vm336_vm15 = vmor %vm334_vm14, %vm335_vm13 }
 0x771   :  { %v331_v43 = vsub.f32 1.0, %v330_v42 }
 0x773   :  { %v332_v44 = vmul.f32 %v983_v41, %v331_v43 }
 0x775   :  { %v333_v45 = vadd.f32 %v983_v41, %v332_v44 }
 0x777   :  { %v337_v48 = vsel %vm336_vm15, %v983_v41, %v333_v45 }
 0x778   :  { %v342_v51 = vsel %vm339_vm1, %v341_v49, %v337_v48 }
 0x779   :  { %v345_v53 = vmul.f32 %v342_v51, %v297_v26 }
 0x7d6   :  { %v348_v50 = vpop.permute.xlu0 %347 }
 0x7d7   :  { %v350_v52 = vmul.f32 %v348_v50, %v342_v51 }
 0x7d9   :  { %352 = vrot.lane.b32.xlu1 %v350_v52, %s1051_s7 }
 0x84b   :  { %v353_v54 = vpop.permute.xlu1 %352 }
 0x84c   :  { %v355_v55 = vadd.f32 %v353_v54, %v345_v53  ;;  %v946_v53 = vld [vmem:[%s1255_s0 + $0x18] sm:$0xff] }
 0x84d   :  { %896 = vmatmul.msk.bf16.gmra.mxu0 %vm80_vm0, %v946_v53 }
 0x84e   :  { %984 = vtanh.f32 %v355_v55 }
 0x854   :  { %v985_v56 = vpop.eup %984 }
 0x855   :  { %358 = vrot.lane.b32.xlu2 %v985_v56, %s1051_s7 }
 0x8af   :  { %v359_v58 = vpop.permute.xlu2 %358 }
 0x8b0   :  { %v361_v59 = vmul.f32 %v359_v58, %v342_v51 }
 0x8b2   :  { %v362_v60 = vpack.c.bf16 %v361_v59, %v361_v59 }
 0x8b4   :  { %364 = vrot.lane.b32.xlu0 %v362_v60, %s1052_s2 }
 0x8ca   :  { %v117_v58 = vpop.f32.mrf.mxu0 }
 0x8cb   :  { %v118_v59 = vadd.f32 %v1125_v6, %v117_v58 }
 0x926   :  { %v365_v61 = vpop.permute.xlu0 %364 }
 0x927   :  { %912 = vmatmul.msk.bf16.vlgmr.msrb.gmra.mxu2 %vm80_vm0, %v365_v61 }
 0x9aa   :  { %v378_v0 = vpop.f32.mrf.mxu2 }
 0x9ab   :  { %v382_v1 = vadd.f32 %v378_v0, %v113_v63 }
 0x9ad   :  { %986 = vtanh.f32 %v382_v1  ;;  %v913_v4 = vmul.f32 -1.442695, %v382_v1 }
 0x9af   :  { %988 = vpow2.f32 %v913_v4 }
 0x9b2   :  { %v380_v2 = vpop.f32.mrf.mxu2 }
 0x9b3   :  { %v987_v3 = vpop.eup %986 }
 0x9b4   :  { %405 = vrot.lane.b32.xlu1 %v987_v3, %s1051_s7 }
 0x9b5   :  { %v989_v5 = vpop.eup %988 }
 0x9b6   :  { %v386_v7 = vadd.f32 1.0, %v989_v5 }
 0x9b8   :  { %990 = vrcp.f32 %v386_v7  ;;  %v398_v13 = vand.u32 2147483648, %v386_v7  ;;  %vm392_vm3 = vweird.f32 %v386_v7  ;;  %v396_v14 = vand.u32 2147483647, %v386_v7 }
 0x9ba   :  { %v399_v16 = vor.u32 1.1754944e-38, %v398_v13  ;;  %vm397_vm5 = vcmp.eq.f32.partialorder %v396_v14, 8.507059e+37 }
 0x9be   :  { %v991_v8 = vpop.eup %990 }
 0x9bf   :  { %v388_v9 = vmul.f32 %v991_v8, %v386_v7  ;;  %vm393_vm2 = vweird.f32 %v991_v8 }
 0x9c0   :  { %vm394_vm4 = vmor %vm392_vm3, %vm393_vm2 }
 0x9c1   :  { %v389_v10 = vsub.f32 1.0, %v388_v9 }
 0x9c3   :  { %v390_v11 = vmul.f32 %v991_v8, %v389_v10 }
 0x9c5   :  { %v391_v12 = vadd.f32 %v991_v8, %v390_v11 }
 0x9c7   :  { %v395_v15 = vsel %vm394_vm4, %v991_v8, %v391_v12 }
 0x9c8   :  { %v400_v18 = vsel %vm397_vm5, %v399_v16, %v395_v15 }
 0x9c9   :  { %v403_v20 = vmul.f32 %v400_v18, %v355_v55 }
 0xa26   :  { %v406_v17 = vpop.permute.xlu1 %405 }
 0xa27   :  { %v408_v19 = vmul.f32 %v406_v17, %v400_v18 }
 0xa29   :  { %410 = vrot.lane.b32.xlu2 %v408_v19, %s1051_s7 }
 0xa83   :  { %v411_v21 = vpop.permute.xlu2 %410 }
 0xa84   :  { %v413_v22 = vadd.f32 %v411_v21, %v403_v20 }
 0xa86   :  { %992 = vtanh.f32 %v413_v22 }
 0xa8c   :  { %v993_v23 = vpop.eup %992 }
 0xa8d   :  { %416 = vrot.lane.b32.xlu0 %v993_v23, %s1051_s7 }
 0xaff   :  { %v417_v24 = vpop.permute.xlu0 %416 }
 0xb00   :  { %v419_v25 = vmul.f32 %v417_v24, %v400_v18  ;;  %v119_v24 = vpop.f32.mrf.mxu0 }
 0xb02   :  { %v420_v26 = vpack.c.bf16 %v419_v25, %v419_v25  ;;  %v120_v25 = vadd.f32 %v1125_v6, %v119_v24 }
 0xb04   :  { %422 = vrot.lane.b32.xlu1 %v420_v26, %s1052_s2 }
 0xb76   :  { %v423_v27 = vpop.permute.xlu1 %422 }
 0xb77   :  { %914 = vmatmul.msk.bf16.vlgmr.msrb.gmra.mxu3 %vm80_vm0, %v423_v27 }
 0xbfa   :  { %v436_v30 = vpop.f32.mrf.mxu3 }
 0xbfb   :  { %v440_v31 = vadd.f32 %v436_v30, %v115_v29 }
 0xbfd   :  { %994 = vtanh.f32 %v440_v31  ;;  %v915_v34 = vmul.f32 -1.442695, %v440_v31 }
 0xbff   :  { %996 = vpow2.f32 %v915_v34 }
 0xc02   :  { %v438_v32 = vpop.f32.mrf.mxu3 }
 0xc03   :  { %v995_v33 = vpop.eup %994 }
 0xc04   :  { %463 = vrot.lane.b32.xlu2 %v995_v33, %s1051_s7 }
 0xc05   :  { %v997_v35 = vpop.eup %996 }
 0xc06   :  { %v444_v36 = vadd.f32 1.0, %v997_v35 }
 0xc08   :  { %998 = vrcp.f32 %v444_v36  ;;  %v456_v42 = vand.u32 2147483648, %v444_v36  ;;  %vm450_vm7 = vweird.f32 %v444_v36  ;;  %v454_v43 = vand.u32 2147483647, %v444_v36 }
 0xc0a   :  { %v457_v45 = vor.u32 1.1754944e-38, %v456_v42  ;;  %vm455_vm9 = vcmp.eq.f32.partialorder %v454_v43, 8.507059e+37 }
 0xc0e   :  { %v999_v37 = vpop.eup %998 }
 0xc0f   :  { %v446_v38 = vmul.f32 %v999_v37, %v444_v36  ;;  %vm451_vm6 = vweird.f32 %v999_v37 }
 0xc10   :  { %vm452_vm8 = vmor %vm450_vm7, %vm451_vm6 }
 0xc11   :  { %v447_v39 = vsub.f32 1.0, %v446_v38 }
 0xc13   :  { %v448_v40 = vmul.f32 %v999_v37, %v447_v39 }
 0xc15   :  { %v449_v41 = vadd.f32 %v999_v37, %v448_v40 }
 0xc17   :  { %v453_v44 = vsel %vm452_vm8, %v999_v37, %v449_v41 }
 0xc18   :  { %v458_v47 = vsel %vm455_vm9, %v457_v45, %v453_v44 }
 0xc19   :  { %v461_v49 = vmul.f32 %v458_v47, %v413_v22 }
 0xc5e   :  { %v464_v46 = vpop.permute.xlu2 %463 }
 0xc5f   :  { %v466_v48 = vmul.f32 %v464_v46, %v458_v47 }
 0xc61   :  { %468 = vrot.lane.b32.xlu0 %v466_v48, %s1051_s7  ;;  %v942_v48 = vld [vmem:[%s1256_s4 + $0x8] sm:$0xff] }
 0xc62   :  { %620 = vmatpush.bf16.msra.mxu3 %v942_v48  ;;  %686 = vmatpush.bf16.msrb.mxu1 %v942_v48 }
 0xc63   :  { %750 = vmatpush.bf16.msrb.mxu2 %v942_v48 }
 0xcd3   :  { %v469_v50 = vpop.permute.xlu0 %468 }
 0xcd4   :  { %v471_v51 = vadd.f32 %v469_v50, %v461_v49  ;;  %v941_v49 = vld [vmem:[%s1256_s4] sm:$0xff] }
 0xcd5   :  { %621 = vmatpush.bf16.msra.mxu3 %v941_v49  ;;  %687 = vmatpush.bf16.msrb.mxu1 %v941_v49 }
 0xcd6   :  { %1000 = vtanh.f32 %v471_v51  ;;  %751 = vmatpush.bf16.msrb.mxu2 %v941_v49 }
 0xcd9   :  { %814 = vmatpush.bf16.msrb.mxu3 %v942_v48 }
 0xcdc   :  { %v1001_v52 = vpop.eup %1000 }
 0xcdd   :  { %474 = vrot.lane.b32.xlu1 %v1001_v52, %s1051_s7  ;;  %815 = vmatpush.bf16.msrb.mxu3 %v941_v49 }
 0xd4f   :  { %v475_v54 = vpop.permute.xlu1 %474 }
 0xd50   :  { %v477_v55 = vmul.f32 %v475_v54, %v458_v47  ;;  %v1198_v54 = vld [vmem:[%s1257_s5] ss:$0 sm:$0xff] }
 0xd52   :  { %v478_v56 = vpack.c.bf16 %v477_v55, %v477_v55 }
 0xd54   :  { %480 = vrot.lane.b32.xlu2 %v478_v56, %s1052_s2 }
 0xdae   :  { %v481_v57 = vpop.permute.xlu2 %480 }
 0xdaf   :  { %916 = vmatmul.msk.bf16.vlgmr.msra.gmra.mxu1 %vm80_vm0, %v481_v57 }
 0xe2c   :  { %v494_v60 = vpop.f32.mrf.mxu1 }
 0xe2d   :  { %v498_v61 = vadd.f32 %v494_v60, %v118_v59 }
 0xe2f   :  { %1002 = vtanh.f32 %v498_v61  ;;  %v917_v0 = vmul.f32 -1.442695, %v498_v61 }
 0xe31   :  { %1004 = vpow2.f32 %v917_v0 }
 0xe34   :  { %v496_v62 = vpop.f32.mrf.mxu1 }
 0xe35   :  { %v1003_v63 = vpop.eup %1002 }
 0xe36   :  { %521 = vrot.lane.b32.xlu0 %v1003_v63, %s1051_s7 }
 0xe37   :  { %v1005_v1 = vpop.eup %1004 }
 0xe38   :  { %v502_v2 = vadd.f32 1.0, %v1005_v1 }
 0xe3a   :  { %1006 = vrcp.f32 %v502_v2  ;;  %v514_v9 = vand.u32 2147483648, %v502_v2  ;;  %vm508_vm11 = vweird.f32 %v502_v2  ;;  %v512_v10 = vand.u32 2147483647, %v502_v2 }
 0xe3c   :  { %v515_v12 = vor.u32 1.1754944e-38, %v514_v9  ;;  %vm513_vm13 = vcmp.eq.f32.partialorder %v512_v10, 8.507059e+37 }
 0xe40   :  { %v1007_v3 = vpop.eup %1006 }
 0xe41   :  { %v504_v4 = vmul.f32 %v1007_v3, %v502_v2  ;;  %vm509_vm10 = vweird.f32 %v1007_v3 }
 0xe42   :  { %vm510_vm12 = vmor %vm508_vm11, %vm509_vm10 }
 0xe43   :  { %v505_v5 = vsub.f32 1.0, %v504_v4 }
 0xe45   :  { %v506_v7 = vmul.f32 %v1007_v3, %v505_v5 }
 0xe47   :  { %v507_v8 = vadd.f32 %v1007_v3, %v506_v7 }
 0xe49   :  { %v511_v11 = vsel %vm510_vm12, %v1007_v3, %v507_v8 }
 0xe4a   :  { %v516_v14 = vsel %vm513_vm13, %v515_v12, %v511_v11 }
 0xe4b   :  { %v519_v16 = vmul.f32 %v516_v14, %v471_v51 }
 0xea8   :  { %v522_v13 = vpop.permute.xlu0 %521 }
 0xea9   :  { %v524_v15 = vmul.f32 %v522_v13, %v516_v14 }
 0xeab   :  { %526 = vrot.lane.b32.xlu1 %v524_v15, %s1051_s7 }
 0xf1d   :  { %v527_v17 = vpop.permute.xlu1 %526 }
 0xf1e   :  { %v529_v18 = vadd.f32 %v527_v17, %v519_v16 }
 0xf20   :  { %1008 = vtanh.f32 %v529_v18 }
 0xf26   :  { %v1009_v19 = vpop.eup %1008 }
 0xf27   :  { %532 = vrot.lane.b32.xlu2 %v1009_v19, %s1051_s7 }
 0xf81   :  { %v533_v20 = vpop.permute.xlu2 %532 }
 0xf82   :  { %v535_v21 = vmul.f32 %v533_v20, %v516_v14 }
 0xf84   :  { %v536_v22 = vpack.c.bf16 %v535_v21, %v535_v21 }
 0xf86   :  { %538 = vrot.lane.b32.xlu0 %v536_v22, %s1052_s2 }
 0xff8   :  { %v539_v23 = vpop.permute.xlu0 %538 }
 0xff9   :  { %918 = vmatmul.msk.bf16.vlgmr.msra.gmra.mxu2 %vm80_vm0, %v539_v23 }
0x107c   :  { %v552_v26 = vpop.f32.mrf.mxu2 }
0x107d   :  { %v556_v27 = vadd.f32 %v552_v26, %v120_v25 }
0x107f   :  { %1010 = vtanh.f32 %v556_v27  ;;  %v919_v30 = vmul.f32 -1.442695, %v556_v27 }
0x1081   :  { %1012 = vpow2.f32 %v919_v30 }
0x1084   :  { %v554_v28 = vpop.f32.mrf.mxu2 }
0x1085   :  { %v1011_v29 = vpop.eup %1010 }
0x1086   :  { %579 = vrot.lane.b32.xlu1 %v1011_v29, %s1051_s7 }
0x1087   :  { %v1013_v31 = vpop.eup %1012 }
0x1088   :  { %v560_v32 = vadd.f32 1.0, %v1013_v31 }
0x108a   :  { %1014 = vrcp.f32 %v560_v32  ;;  %v572_v38 = vand.u32 2147483648, %v560_v32  ;;  %vm566_vm15 = vweird.f32 %v560_v32  ;;  %v570_v6 = vand.u32 2147483647, %v560_v32 }
0x108c   :  { %v573_v40 = vor.u32 1.1754944e-38, %v572_v38  ;;  %vm571_vm2 = vcmp.eq.f32.partialorder %v570_v6, 8.507059e+37 }
0x1090   :  { %v1015_v33 = vpop.eup %1014 }
0x1091   :  { %v562_v34 = vmul.f32 %v1015_v33, %v560_v32  ;;  %vm567_vm14 = vweird.f32 %v1015_v33 }
0x1092   :  { %vm568_vm1 = vmor %vm566_vm15, %vm567_vm14 }
0x1093   :  { %v563_v35 = vsub.f32 1.0, %v562_v34 }
0x1095   :  { %v564_v36 = vmul.f32 %v1015_v33, %v563_v35 }
0x1097   :  { %v565_v37 = vadd.f32 %v1015_v33, %v564_v36 }
0x1099   :  { %v569_v39 = vsel %vm568_vm1, %v1015_v33, %v565_v37 }
0x109a   :  { %v574_v42 = vsel %vm571_vm2, %v573_v40, %v569_v39 }
0x109b   :  { %v577_v44 = vmul.f32 %v574_v42, %v529_v18 }
0x10f8   :  { %v580_v41 = vpop.permute.xlu1 %579 }
0x10f9   :  { %v582_v43 = vmul.f32 %v580_v41, %v574_v42 }
0x10fb   :  { %584 = vrot.lane.b32.xlu2 %v582_v43, %s1051_s7 }
0x1155   :  { %v585_v45 = vpop.permute.xlu2 %584 }
0x1156   :  { %v587_v46 = vadd.f32 %v585_v45, %v577_v44 }
0x1158   :  { %1016 = vtanh.f32 %v587_v46 }
0x115e   :  { %v1017_v47 = vpop.eup %1016 }
0x115f   :  { %590 = vrot.lane.b32.xlu0 %v1017_v47, %s1051_s7 }
0x11d1   :  { %v591_v50 = vpop.permute.xlu0 %590 }
0x11d2   :  { %v593_v51 = vmul.f32 %v591_v50, %v574_v42 }
0x11d4   :  { %v595_v52 = vpack.c.bf16 %v593_v51, %v593_v51 }
0x11d6   :  { %597 = vrot.lane.b32.xlu1 %v595_v52, %s1052_s2 }
0x1248   :  { %v598_v53 = vpop.permute.xlu1 %597 }
0x1249   :  { %928 = vmatmul.msk.bf16.vlgmr.msra.gmra.mxu3 %vm80_vm0, %v598_v53 }
0x12cc   :  { %v623_v55 = vpop.f32.mrf.mxu3 }
0x12cd   :  { %v630_v56 = vadd.f32 %v1198_v54, %v623_v55 }
0x12cf   :  { %1018 = vtanh.f32 %v630_v56  ;;  %v929_v59 = vmul.f32 -1.442695, %v630_v56 }
0x12d1   :  { %1020 = vpow2.f32 %v929_v59 }
0x12d4   :  { %v625_v57 = vpop.f32.mrf.mxu3 }
0x12d5   :  { %v1019_v58 = vpop.eup %1018 }
0x12d6   :  { %653 = vrot.lane.b32.xlu2 %v1019_v58, %s1051_s7 }
0x12d7   :  { %v1021_v60 = vpop.eup %1020 }
0x12d8   :  { %v634_v61 = vadd.f32 1.0, %v1021_v60 }
0x12da   :  { %1022 = vrcp.f32 %v634_v61  ;;  %v646_v3 = vand.u32 2147483648, %v634_v61  ;;  %vm640_vm4 = vweird.f32 %v634_v61  ;;  %v644_v4 = vand.u32 2147483647, %v634_v61 }
0x12dc   :  { %v647_v7 = vor.u32 1.1754944e-38, %v646_v3  ;;  %vm645_vm6 = vcmp.eq.f32.partialorder %v644_v4, 8.507059e+37 }
0x12e0   :  { %v1023_v62 = vpop.eup %1022 }
0x12e1   :  { %v636_v63 = vmul.f32 %v1023_v62, %v634_v61  ;;  %vm641_vm3 = vweird.f32 %v1023_v62 }
0x12e2   :  { %vm642_vm5 = vmor %vm640_vm4, %vm641_vm3 }
0x12e3   :  { %v637_v0 = vsub.f32 1.0, %v636_v63 }
0x12e5   :  { %v638_v1 = vmul.f32 %v1023_v62, %v637_v0 }
0x12e7   :  { %v639_v2 = vadd.f32 %v1023_v62, %v638_v1 }
0x12e9   :  { %v643_v5 = vsel %vm642_vm5, %v1023_v62, %v639_v2 }
0x12ea   :  { %v648_v9 = vsel %vm645_vm6, %v647_v7, %v643_v5 }
0x12eb   :  { %v651_v11 = vmul.f32 %v648_v9, %v587_v46 }
0x1330   :  { %v654_v8 = vpop.permute.xlu2 %653 }
0x1331   :  { %v656_v10 = vmul.f32 %v654_v8, %v648_v9 }
0x1333   :  { %658 = vrot.lane.b32.xlu0 %v656_v10, %s1051_s7 }
0x13a5   :  { %v659_v12 = vpop.permute.xlu0 %658 }
0x13a6   :  { %v661_v13 = vadd.f32 %v659_v12, %v651_v11 }
0x13a8   :  { %1024 = vtanh.f32 %v661_v13 }
0x13ae   :  { %v1025_v14 = vpop.eup %1024 }
0x13af   :  { %664 = vrot.lane.b32.xlu1 %v1025_v14, %s1051_s7 }
0x1421   :  { %v665_v15 = vpop.permute.xlu1 %664 }
0x1422   :  { %v1204_v16 = vmul.f32 %v665_v15, %v648_v9 }
0x1424   :  { %v673_v17 = vpack.c.bf16 %v1204_v16, %v1204_v16 }
0x1426   :  { %675 = vrot.lane.b32.xlu2 %v673_v17, %s1052_s2 }
0x1480   :  { %v676_v18 = vpop.permute.xlu2 %675 }
0x1481   :  { %930 = vmatmul.msk.bf16.vlgmr.msrb.gmra.mxu1 %vm80_vm0, %v676_v18 }
0x14fe   :  { %v689_v19 = vpop.f32.mrf.mxu1 }
0x14ff   :  { %v693_v20 = vadd.f32 %v1198_v54, %v689_v19 }
0x1501   :  { %1026 = vtanh.f32 %v693_v20  ;;  %v931_v23 = vmul.f32 -1.442695, %v693_v20 }
0x1503   :  { %1028 = vpow2.f32 %v931_v23 }
0x1506   :  { %v691_v21 = vpop.f32.mrf.mxu1 }
0x1507   :  { %v1027_v22 = vpop.eup %1026 }
0x1508   :  { %716 = vrot.lane.b32.xlu0 %v1027_v22, %s1051_s7 }
0x1509   :  { %v1029_v24 = vpop.eup %1028 }
0x150a   :  { %v697_v25 = vadd.f32 1.0, %v1029_v24 }
0x150c   :  { %1030 = vrcp.f32 %v697_v25  ;;  %v709_v31 = vand.u32 2147483648, %v697_v25  ;;  %vm703_vm8 = vweird.f32 %v697_v25  ;;  %v707_v32 = vand.u32 2147483647, %v697_v25 }
0x150e   :  { %v710_v34 = vor.u32 1.1754944e-38, %v709_v31  ;;  %vm708_vm10 = vcmp.eq.f32.partialorder %v707_v32, 8.507059e+37 }
0x1512   :  { %v1031_v26 = vpop.eup %1030 }
0x1513   :  { %v699_v27 = vmul.f32 %v1031_v26, %v697_v25  ;;  %vm704_vm7 = vweird.f32 %v1031_v26 }
0x1514   :  { %vm705_vm9 = vmor %vm703_vm8, %vm704_vm7 }
0x1515   :  { %v700_v28 = vsub.f32 1.0, %v699_v27 }
0x1517   :  { %v701_v29 = vmul.f32 %v1031_v26, %v700_v28 }
0x1519   :  { %v702_v30 = vadd.f32 %v1031_v26, %v701_v29 }
0x151b   :  { %v706_v33 = vsel %vm705_vm9, %v1031_v26, %v702_v30 }
0x151c   :  { %v711_v36 = vsel %vm708_vm10, %v710_v34, %v706_v33 }
0x151d   :  { %v714_v38 = vmul.f32 %v711_v36, %v661_v13 }
0x157a   :  { %v717_v35 = vpop.permute.xlu0 %716 }
0x157b   :  { %v719_v37 = vmul.f32 %v717_v35, %v711_v36 }
0x157d   :  { %721 = vrot.lane.b32.xlu1 %v719_v37, %s1051_s7 }
0x15ef   :  { %v722_v6 = vpop.permute.xlu1 %721 }
0x15f0   :  { %v724_v39 = vadd.f32 %v722_v6, %v714_v38 }
0x15f2   :  { %1032 = vtanh.f32 %v724_v39 }
0x15f8   :  { %v1033_v40 = vpop.eup %1032 }
0x15f9   :  { %727 = vrot.lane.b32.xlu2 %v1033_v40, %s1051_s7 }
0x1653   :  { %v728_v41 = vpop.permute.xlu2 %727 }
0x1654   :  { %v1214_v42 = vmul.f32 %v728_v41, %v711_v36 }
0x1656   :  { %v737_v43 = vpack.c.bf16 %v1214_v42, %v1214_v42 }
0x1658   :  { %739 = vrot.lane.b32.xlu0 %v737_v43, %s1052_s2 }
0x16ca   :  { %v740_v44 = vpop.permute.xlu0 %739 }
0x16cb   :  { %933 = vmatmul.msk.bf16.vlgmr.msrb.gmra.mxu2 %vm80_vm0, %v740_v44 }
0x174e   :  { %v753_v45 = vpop.f32.mrf.mxu2 }
0x174f   :  { %v757_v46 = vadd.f32 %v1198_v54, %v753_v45 }
0x1751   :  { %1034 = vtanh.f32 %v757_v46  ;;  %v934_v49 = vmul.f32 -1.442695, %v757_v46 }
0x1753   :  { %1036 = vpow2.f32 %v934_v49 }
0x1756   :  { %v755_v47 = vpop.f32.mrf.mxu2 }
0x1757   :  { %v1035_v48 = vpop.eup %1034 }
0x1758   :  { %780 = vrot.lane.b32.xlu1 %v1035_v48, %s1051_s7 }
0x1759   :  { %v1037_v50 = vpop.eup %1036 }
0x175a   :  { %v761_v51 = vadd.f32 1.0, %v1037_v50 }
0x175c   :  { %1038 = vrcp.f32 %v761_v51  ;;  %v773_v58 = vand.u32 2147483648, %v761_v51  ;;  %vm767_vm12 = vweird.f32 %v761_v51  ;;  %v771_v59 = vand.u32 2147483647, %v761_v51 }
0x175e   :  { %v774_v61 = vor.u32 1.1754944e-38, %v773_v58  ;;  %vm772_vm14 = vcmp.eq.f32.partialorder %v771_v59, 8.507059e+37 }
0x1762   :  { %v1039_v52 = vpop.eup %1038 }
0x1763   :  { %v763_v53 = vmul.f32 %v1039_v52, %v761_v51  ;;  %vm768_vm11 = vweird.f32 %v1039_v52 }
0x1764   :  { %vm769_vm13 = vmor %vm767_vm12, %vm768_vm11 }
0x1765   :  { %v764_v55 = vsub.f32 1.0, %v763_v53 }
0x1767   :  { %v765_v56 = vmul.f32 %v1039_v52, %v764_v55 }
0x1769   :  { %v766_v57 = vadd.f32 %v1039_v52, %v765_v56 }
0x176b   :  { %v770_v60 = vsel %vm769_vm13, %v1039_v52, %v766_v57 }
0x176c   :  { %v775_v63 = vsel %vm772_vm14, %v774_v61, %v770_v60 }
0x176d   :  { %v778_v1 = vmul.f32 %v775_v63, %v724_v39 }
0x17ca   :  { %v781_v62 = vpop.permute.xlu1 %780 }
0x17cb   :  { %v783_v0 = vmul.f32 %v781_v62, %v775_v63 }
0x17cd   :  { %785 = vrot.lane.b32.xlu2 %v783_v0, %s1051_s7 }
0x1827   :  { %v786_v2 = vpop.permute.xlu2 %785 }
0x1828   :  { %v788_v3 = vadd.f32 %v786_v2, %v778_v1 }
0x182a   :  { %1040 = vtanh.f32 %v788_v3 }
0x1830   :  { %v1041_v4 = vpop.eup %1040 }
0x1831   :  { %791 = vrot.lane.b32.xlu0 %v1041_v4, %s1051_s7 }
0x18a3   :  { %v792_v5 = vpop.permute.xlu0 %791 }
0x18a4   :  { %v794_v7 = vmul.f32 %v792_v5, %v775_v63 }
0x18a6   :  { %v801_v8 = vpack.c.bf16 %v794_v7, %v794_v7 }
0x18a8   :  { %803 = vrot.lane.b32.xlu1 %v801_v8, %s1052_s2 }
0x191a   :  { %v804_v9 = vpop.permute.xlu1 %803 }
0x191b   :  { %936 = vmatmul.msk.bf16.vlgmr.msrb.gmra.mxu3 %vm80_vm0, %v804_v9 }
0x199e   :  { %v817_v10 = vpop.f32.mrf.mxu3 }
0x199f   :  { %v821_v11 = vadd.f32 %v1198_v54, %v817_v10 }
0x19a1   :  { %1042 = vtanh.f32 %v821_v11  ;;  %v937_v14 = vmul.f32 -1.442695, %v821_v11 }
0x19a3   :  { %1044 = vpow2.f32 %v937_v14 }
0x19a6   :  { %v819_v12 = vpop.f32.mrf.mxu3 }
0x19a7   :  { %v1043_v13 = vpop.eup %1042 }
0x19a8   :  { %844 = vrot.lane.b32.xlu2 %v1043_v13, %s1051_s7 }
0x19a9   :  { %v1045_v15 = vpop.eup %1044 }
0x19aa   :  { %v825_v17 = vadd.f32 1.0, %v1045_v15 }
0x19ac   :  { %1046 = vrcp.f32 %v825_v17  ;;  %v837_v54 = vand.u32 2147483648, %v825_v17  ;;  %vm831_vm1 = vweird.f32 %v825_v17  ;;  %v835_v23 = vand.u32 2147483647, %v825_v17 }
0x19ae   :  { %v838_v25 = vor.u32 1.1754944e-38, %v837_v54  ;;  %vm836_vm3 = vcmp.eq.f32.partialorder %v835_v23, 8.507059e+37 }
0x19b0   :  { %669 = vrot.lane.b32.xlu2 %v1204_v16, %s1052_s2 }
0x19b2   :  { %v1047_v18 = vpop.eup %1046 }
0x19b3   :  { %v827_v19 = vmul.f32 %v1047_v18, %v825_v17  ;;  %vm832_vm15 = vweird.f32 %v1047_v18 }
0x19b4   :  { %vm833_vm2 = vmor %vm831_vm1, %vm832_vm15 }
0x19b5   :  { %v828_v20 = vsub.f32 1.0, %v827_v19 }
0x19b7   :  { %v829_v21 = vmul.f32 %v1047_v18, %v828_v20 }
0x19b9   :  { %v830_v22 = vadd.f32 %v1047_v18, %v829_v21 }
0x19bb   :  { %v834_v24 = vsel %vm833_vm2, %v1047_v18, %v830_v22 }
0x19bc   :  { %v839_v16 = vsel %vm836_vm3, %v838_v25, %v834_v24 }
0x19bd   :  { %v842_v29 = vmul.f32 %v839_v16, %v788_v3 }
0x1a02   :  { %v845_v26 = vpop.permute.xlu2 %844 }
0x1a03   :  { %v847_v27 = vmul.f32 %v845_v26, %v839_v16 }
0x1a05   :  { %849 = vrot.lane.b32.xlu0 %v847_v27, %s1051_s7 }
0x1a0a   :  { %v670_v28 = vpop.permute.xlu2 %669 }
0x1a0b   :  { %672 = vst.msk [vmem:[%s1258_s6] sm:$0xff] %vm80_vm0, %v670_v28 }
0x1a0d   :  { %732 = vrot.lane.b32.xlu0 %v1214_v42, %s1052_s2 }
0x1a77   :  { %v850_v30 = vpop.permute.xlu0 %849 }
0x1a78   :  { %v852_v31 = vadd.f32 %v850_v30, %v842_v29 }
0x1a7a   :  { %1048 = vtanh.f32 %v852_v31 }
0x1a7f   :  { %v733_v32 = vpop.permute.xlu0 %732 }
0x1a80   :  { %v1049_v33 = vpop.eup %1048  ;;  %932 = vst.msk [vmem:[%s1258_s6 + $0x8] sm:$0xff] %vm80_vm0, %v733_v32 }
0x1a81   :  { %855 = vrot.lane.b32.xlu1 %v1049_v33, %s1051_s7 }
0x1a89   :  { %796 = vrot.lane.b32.xlu1 %v794_v7, %s1052_s2 }
0x1af3   :  { %v856_v34 = vpop.permute.xlu1 %855 }
0x1af4   :  { %v858_v35 = vmul.f32 %v856_v34, %v839_v16 }
0x1af6   :  { %860 = vrot.lane.b32.xlu2 %v858_v35, %s1052_s2 }
0x1afb   :  { %v797_v36 = vpop.permute.xlu1 %796 }
0x1afc   :  { %935 = vst.msk [vmem:[%s1258_s6 + $0x10] sm:$0xff] %vm80_vm0, %v797_v36 }
0x1b50   :  { %v861_v37 = vpop.permute.xlu2 %860 }
0x1b51   :  { %938 = vst.msk [vmem:[%s1258_s6 + $0x18] sm:$0xff] %vm80_vm0, %v861_v37 }

</bundles_post_ra>
